<compile_context>
chip_gen: v5e
topology: v5e:2x2
jax: 0.10.0
libtpu: 0.0.40
codegen_flags: <defaults>
</compile_context>

<pallas_src>
import jax
import jax.numpy as jnp
from jax.experimental import pallas as pl
from jax.experimental.pallas import tpu as pltpu


def _round_up(x: int, m: int) -> int:
    return (x + m - 1) // m * m


def _largest_divisor(total: int, unit: int, cap: int) -> int:
    """Largest d <= cap with d % unit == 0 and total % d == 0 (total % unit == 0)."""
    d = max(unit, (min(cap, total) // unit) * unit)
    while d > unit:
        if total % d == 0:
            return d
        d -= unit
    return unit


def _patch_embed_kernel(x_ref, w_ref, b_ref, o_ref):
    # One (tm, tn) output tile per grid step: dot + bias, no accumulator needed
    # because the full K reduction happens inside a single MXU call.
    o_ref[...] = (
        jnp.dot(x_ref[...], w_ref[...], preferred_element_type=jnp.float32)
        + b_ref[...]
    ).astype(o_ref.dtype)


def custom_patch_embed(
    x, weight, bias, patch_width, *, target_tm=1024, compute_dtype=jnp.bfloat16
):
    """x: (B, C, H, W) NCHW; weight: (embed_dim, C, H, pw); bias: (embed_dim,).

    Returns (B, num_patches, embed_dim), num_patches = W // patch_width,
    matching CustomPatchEmbed.forward (flatten=True, norm=Identity).
    """
    B, C, H, W = x.shape
    pw = patch_width
    assert W % pw == 0, "strict_img_size: W must be divisible by patch_width"
    num_patches = W // pw
    embed_dim = weight.shape[0]
    assert weight.shape == (embed_dim, C, H, pw)
    out_dtype = x.dtype
    out_sz = jnp.dtype(out_dtype).itemsize
    cd_sz = jnp.dtype(compute_dtype).itemsize

    # im2col of vertical strips, flattened in (C, H, pw) order to match the
    # Conv2d weight layout.  One fused XLA cast+transpose+copy in bf16; no
    # padding is interposed unless M needs 8-alignment (rare).
    patches = (
        x.astype(compute_dtype)
        .reshape(B, C, H, num_patches, pw)
        .transpose(0, 3, 1, 2, 4)
        .reshape(B * num_patches, C * H * pw)
    )
    w2d = weight.reshape(embed_dim, C * H * pw).T.astype(compute_dtype)  # (K, N)
    b2d = bias.reshape(1, embed_dim).astype(jnp.float32)                 # (1, N)

    M, K = patches.shape
    N = embed_dim

    # ---- N tiling: keep the whole (K, tn) weight slab resident in VMEM. ----
    weight_budget = 24 << 20  # budget for the (double-buffered) resident weight
    if 2 * K * N * cd_sz <= weight_budget or N % 128 != 0:
        tn = N  # typical patch-embed: whole weight resident, 1-D stream over M
    else:
        cap_n = max(128, (weight_budget // (2 * K * cd_sz)) // 128 * 128)
        tn = _largest_divisor(N, 128, cap_n)
        # TODO(synk): add a K-tiled accumulator fallback if even a 128-wide
        # weight slab cannot fit VMEM (does not occur for patch-embed shapes).
    num_j = N // tn

    # ---- M tiling: divisor of 8-aligned M; >=2 tiles when possible so both ----
    # ---- v7x TensorCores get work; capped by a v7x-safe VMEM budget.       ----
    Mp = _round_up(M, 8)
    half_cap = Mp if Mp < 16 else max(8, (Mp // 2) // 8 * 8)
    vmem_budget = 36 << 20
    fixed = 2 * K * tn * cd_sz + 2 * tn * 4            # weight + bias buffers
    per_row = 2 * K * cd_sz + 2 * tn * out_sz          # streamed patches + out rows
    vmem_cap = max(8, (max(vmem_budget - fixed, 8 * per_row) // per_row) // 8 * 8)
    tm = _largest_divisor(Mp, 8, max(8, min(target_tm, half_cap, vmem_cap)))
    num_i = Mp // tm

    patches_p = patches if Mp == M else jnp.pad(patches, ((0, Mp - M), (0, 0)))

    footprint = 2 * tm * K * cd_sz + fixed + 2 * tm * tn * out_sz
    vmem_limit = int(min(56 << 20, max(32 << 20, footprint * 13 // 10 + (1 << 20))))

    cost = pl.CostEstimate(
        flops=2 * Mp * K * N,
        transcendentals=0,
        bytes_accessed=(
            patches_p.size * cd_sz + K * N * cd_sz + N * 4 + Mp * N * out_sz
        ),
    )

    out_p = pl.pallas_call(
        _patch_embed_kernel,
        out_shape=jax.ShapeDtypeStruct((Mp, N), out_dtype),
        grid_spec=pltpu.PrefetchScalarGridSpec(
            num_scalar_prefetch=0,
            grid=(num_j, num_i),
            in_specs=[
                pl.BlockSpec((tm, K), lambda j, i: (i, 0)),  # patches: streamed
                pl.BlockSpec((K, tn), lambda j, i: (0, j)),  # weight: resident per j
                pl.BlockSpec((1, tn), lambda j, i: (0, j)),  # bias:   resident per j
            ],
            out_specs=pl.BlockSpec((tm, tn), lambda j, i: (i, j)),
        ),
        compiler_params=pltpu.CompilerParams(
            dimension_semantics=("parallel", "parallel"),
            vmem_limit_bytes=vmem_limit,
        ),
        cost_estimate=cost,
    )(patches_p, w2d, b2d)

    out = out_p if Mp == M else out_p[:M]
    return out.reshape(B, num_patches, embed_dim)


def _reference_f32(x, weight, bias, pw):
    B, C, H, W = x.shape
    npch = W // pw
    ed = weight.shape[0]
    p = (
        x.reshape(B, C, H, npch, pw)
        .transpose(0, 3, 1, 2, 4)
        .reshape(B * npch, C * H * pw)
    )
    w2d = weight.reshape(ed, -1).T
    ref = (p @ w2d + bias).reshape(B, npch, ed)
    ref_bf16 = (
        jnp.dot(
            p.astype(jnp.bfloat16),
            w2d.astype(jnp.bfloat16),
            preferred_element_type=jnp.float32,
        )
        + bias
    ).reshape(B, npch, ed)
    return ref, ref_bf16


def _check(x, weight, bias, pw):
    B, _, _, W = x.shape
    npch = W // pw
    ed = weight.shape[0]
    out = jax.block_until_ready(custom_patch_embed(x, weight, bias, pw))
    assert out.shape == (B, npch, ed)
    ref, ref_bf16 = _reference_f32(x, weight, bias, pw)
    # Loose tolerance vs exact f32 conv-as-matmul (kernel streams bf16 operands).
    assert jnp.allclose(out, ref, atol=5e-2, rtol=5e-2)
    # Tight tolerance vs the same bf16-operand / f32-accumulate numerics.
    assert jnp.allclose(out, ref_bf16.astype(out.dtype), atol=1e-3, rtol=1e-3)


if __name__ == "__main__":
    key = jax.random.PRNGKey(0)

    # Test 1: module-consistent small shapes (img_size=16, patch_width=4,
    # in_chans=4, embed_dim=32) -> num_patches = 4, single-tile path.
    k1, k2, k3, k4, k5, k6 = jax.random.split(key, 6)
    x1 = jax.random.normal(k1, (2, 4, 16, 16), dtype=jnp.float32)
    w1 = jax.random.normal(k2, (32, 4, 16, 4), dtype=jnp.float32) * 0.02
    b1 = jax.random.normal(k3, (32,), dtype=jnp.float32) * 0.02
    _check(x1, w1, b1, 4)

    # Test 2: odd M (B*num_patches = 15 -> padded to 16, 2 M-tiles, slice-back)
    # and K/N not multiples of 128 (full-dim blocks).
    x2 = jax.random.normal(k4, (3, 3, 8, 20), dtype=jnp.float32)
    w2 = jax.random.normal(k5, (48, 3, 8, 4), dtype=jnp.float32) * 0.02
    b2 = jax.random.normal(k6, (48,), dtype=jnp.float32) * 0.02
    _check(x2, w2, b2, 4)

    print("KERNEL_OK")
</pallas_src>

<mosaic_0001>
module attributes {stable_mosaic.version = 11 : i64} {
  func.func @_patch_embed_kernel(%arg0: i32, %arg1: i32, %arg2: memref<8x256xbf16, #tpu.memory_space<vmem>>, %arg3: memref<256x32xbf16, #tpu.memory_space<vmem>>, %arg4: memref<1x32xf32, #tpu.memory_space<vmem>>, %arg5: memref<8x32xf32, #tpu.memory_space<vmem>>) attributes {dimension_semantics = [#tpu.dimension_semantics<parallel>, #tpu.dimension_semantics<parallel>], iteration_bounds = array<i64: 1, 1>, scalar_prefetch = 0 : i64, scratch_operands = 0 : i64, tpu.core_type = #tpu.core_type<tc>, window_params = [{transform_indices = @transform_0, window_bounds = array<i64: 8, 256>}, {transform_indices = @transform_1, window_bounds = array<i64: 256, 32>}, {transform_indices = @transform_2, window_bounds = array<i64: 1, 32>}, {transform_indices = @transform_3, window_bounds = array<i64: 8, 32>}]} {
    %c0 = arith.constant 0 : index
    %c0_0 = arith.constant 0 : index
    %0 = vector.load %arg2[%c0, %c0_0] : memref<8x256xbf16, #tpu.memory_space<vmem>>, vector<8x256xbf16>
    %c0_1 = arith.constant 0 : index
    %c0_2 = arith.constant 0 : index
    %1 = vector.load %arg3[%c0_1, %c0_2] : memref<256x32xbf16, #tpu.memory_space<vmem>>, vector<256x32xbf16>
    %cst = arith.constant dense<0.000000e+00> : vector<8x32xf32>
    %2 = tpu.matmul %0, %1, %cst {dimension_numbers = #tpu.dot_dimension_numbers<[1], [0], [0], [1], [0, 0, 1, 1], [], []>} : vector<8x256xbf16>, vector<256x32xbf16>, vector<8x32xf32> -> vector<8x32xf32>
    %c0_3 = arith.constant 0 : index
    %c0_4 = arith.constant 0 : index
    %3 = vector.load %arg4[%c0_3, %c0_4] : memref<1x32xf32, #tpu.memory_space<vmem>>, vector<1x32xf32>
    %4 = vector.broadcast %3 : vector<1x32xf32> to vector<8x32xf32>
    %5 = arith.addf %2, %4 : vector<8x32xf32>
    %c0_5 = arith.constant 0 : index
    %c0_6 = arith.constant 0 : index
    %6 = vector.load %arg5[%c0_5, %c0_6] : memref<8x32xf32, #tpu.memory_space<vmem>>, vector<8x32xf32>
    tpu.vector_store %arg5[%c0_5, %c0_6], %5 {strides = array<i32>} : memref<8x32xf32, #tpu.memory_space<vmem>>, vector<8x32xf32>,
    return
  }
  func.func @transform_0(%arg0: i32, %arg1: i32) -> (i32, i32) {
    %c0_i32 = arith.constant 0 : i32
    %c0_i32_0 = arith.constant 0 : i32
    return %arg1, %c0_i32 : i32, i32
  }
  func.func @transform_1(%arg0: i32, %arg1: i32) -> (i32, i32) {
    %c0_i32 = arith.constant 0 : i32
    %c0_i32_0 = arith.constant 0 : i32
    return %c0_i32, %arg0 : i32, i32
  }
  func.func @transform_2(%arg0: i32, %arg1: i32) -> (i32, i32) {
    %c0_i32 = arith.constant 0 : i32
    %c0_i32_0 = arith.constant 0 : i32
    return %c0_i32, %arg0 : i32, i32
  }
  func.func @transform_3(%arg0: i32, %arg1: i32) -> (i32, i32) {
    %c0_i32 = arith.constant 0 : i32
    return %arg1, %arg0 : i32, i32
  }
}

</mosaic_0001>

<bundles_post_ra>
// kernel: tpu_custom_call.1
= control target key start
LH: loop header
LB: loop body
LE: loop exit
PB: predicated region body
PF: predicated region fallthrough
CT: control target
= control target key end

     0   :  { %s385_s0 = inlined_call_operand.vmem [shape: bf16[8,256], index: 0, kind: input, shape index: {}]   ;;  %s386_s1 = inlined_call_operand.vmem [shape: bf16[256,32], index: 1, kind: input, shape index: {}]   ;;  %s387_s2 = inlined_call_operand.vmem [shape: f32[1,32], index: 2, kind: input, shape index: {}]   ;;  %s388_s3 = inlined_call_operand.hbm [shape: f32[8,32], index: 3, kind: output, shape index: {}]  }
   0x1   :  { %v270_v0 = vld [vmem:[%s386_s1 + $0x38] sm:$0xff]  ;;  %v269_v2 = vld [vmem:[%s386_s1 + $0x30] sm:$0xff]  ;;  %v268_v4 = vld [vmem:[%s386_s1 + $0x28] sm:$0xff] }
   0x2   :  { %v278_v1 = vld [vmem:[%s386_s1 + $0x78] sm:$0xff]  ;;  %155 = vmatpush.bf16.msra.mxu0 %v270_v0  ;;  %v277_v3 = vld [vmem:[%s386_s1 + $0x70] sm:$0xff]  ;;  %v276_v5 = vld [vmem:[%s386_s1 + $0x68] sm:$0xff] }
   0x3   :  { %168 = vmatpush.bf16.msra.mxu1 %v278_v1 }
   0x6   :  { %156 = vmatpush.bf16.msra.mxu0 %v269_v2 }
   0x7   :  { %169 = vmatpush.bf16.msra.mxu1 %v277_v3 }
   0x8   :  { %8 = vsyncpa [#allocation3], 0  ;;  %v267_v6 = vld [vmem:[%s386_s1 + $0x20] sm:$0xff]  ;;  %v266_v8 = vld [vmem:[%s386_s1 + $0x18] sm:$0xff]  ;;  %s307_s20 = smov [#allocation2]   ;;  %s190_s24 = sshll.u32 %s388_s3, 4  ;;  %s191_s24 = int_to_ptr.hbm [resolvable:$true] %s190_s24 }
   0x9   :  { %v275_v7 = vld [vmem:[%s386_s1 + $0x60] sm:$0xff]  ;;  %v274_v9 = vld [vmem:[%s386_s1 + $0x58] sm:$0xff]  ;;  %v265_v10 = vld [vmem:[%s386_s1 + $0x10] sm:$0xff]  ;;  %s188_s21 = sshll.u32 %s307_s20, 4  ;;  %vm181_vm0 = vcmask 261120   ;;  %s189_s21 = int_to_ptr.vmem [resolvable:$true] %s188_s21 }
   0xa   :  { %157 = vmatpush.bf16.msra.mxu0 %v268_v4  ;;  %v273_v11 = vld [vmem:[%s386_s1 + $0x50] sm:$0xff]  ;;  %v264_v12 = vld [vmem:[%s386_s1 + $0x8] sm:$0xff]  ;;  %v15_v14 = vld [vmem:[%s385_s0] sm:$0xff] }
   0xb   :  { %170 = vmatpush.bf16.msra.mxu1 %v276_v5  ;;  %v272_v13 = vld [vmem:[%s386_s1 + $0x48] sm:$0xff]  ;;  %v53_v15 = vunpack.c.l.b16 %v15_v14  ;;  %v54_v16 = vunpack.c.h.b16 %v15_v14  ;;  %v263_v17 = vld [vmem:[%s386_s1] sm:$0xff] }
   0xc   :  { %v271_v18 = vld [vmem:[%s386_s1 + $0x40] sm:$0xff] }
   0xd   :  { %v55_v19 = vpack.c.b16 %v53_v15, %v53_v15  ;;  %v56_v20 = vpack.c.b16 %v54_v16, %v54_v16  ;;  %v280_v21 = vld [vmem:[%s387_s2] ss:$0 sm:$0xff] }
   0xe   :  { %158 = vmatpush.bf16.msra.mxu0 %v267_v6 }
   0xf   :  { %171 = vmatpush.bf16.msra.mxu1 %v275_v7 }
  0x12   :  { %159 = vmatpush.bf16.msra.mxu0 %v266_v8 }
  0x13   :  { %172 = vmatpush.bf16.msra.mxu1 %v274_v9 }
  0x16   :  { %160 = vmatpush.bf16.msra.mxu0 %v265_v10 }
  0x17   :  { %173 = vmatpush.bf16.msra.mxu1 %v273_v11 }
  0x1a   :  { %161 = vmatpush.bf16.msra.mxu0 %v264_v12 }
  0x1b   :  { %174 = vmatpush.bf16.msra.mxu1 %v272_v13 }
  0x1e   :  { %162 = vmatpush.bf16.msra.mxu0 %v263_v17 }
  0x1f   :  { %175 = vmatpush.bf16.msra.mxu1 %v271_v18 }
  0x21   :  { %163 = vmatmul.bf16.vlgmr.msra.gmra.mxu0 %v55_v19 }
  0x22   :  { %176 = vmatmul.bf16.vlgmr.msra.gmra.mxu1 %v56_v20 }
  0x9e   :  { %v164_v22 = vpop.f32.mrf.mxu0 }
  0x9f   :  { %v177_v23 = vpop.f32.mrf.mxu1  ;;  %v165_v24 = vadd.f32 %v280_v21, %v164_v22 }
  0xa1   :  { %v178_v25 = vadd.f32 %v177_v23, %v165_v24 }
  0xa3   :  { %182 = vst.msk [vmem:[#allocation2] sm:$0xff] %vm181_vm0, %v178_v25 }
  0xa4   :  { %193 = dma.vmem_to_hbm [thread:$0]  %s189_s21, 128, %s191_s24, [#allocation3]  }
  0xa6   :  { %v166_v26 = vpop.f32.mrf.mxu0 }
  0xa7   :  { %v179_v27 = vpop.f32.mrf.mxu1 }
  0xa8   :  { %305 = dma.done.wait [#allocation3], 128  }
  0xa9   :  { %306 = vsyncadd [#allocation3], 4294967168 }
  0xaa   :  { %198 = vsyncpa [#allocation3], 1 }

</bundles_post_ra>
